<compile_context>
chip_gen: v7x
topology: tpu7x:2x2x1
jax: 0.10.0
libtpu: 0.0.40
codegen_flags: <defaults>
</compile_context>

<pallas_src>
import jax
import jax.numpy as jnp
from jax.experimental import pallas as pl
from jax.experimental.pallas import tpu as pltpu

H1_RAW, H2_RAW = 400, 300
H1, H2 = 512, 384          # lane-dense padded hidden widths (multiples of 128)
OUT_PAD = 128              # lane-dense output slab width


def _round_up(n, m):
    return ((n + m - 1) // m) * m


def _critic_kernel(s_ref, a_ref, w1s_ref, w1a_ref, b1_ref,
                   w2_ref, b2_ref, w3_ref, b3_ref, o_ref):
    # Layer 1: fused concat -> two MXU matmuls accumulating into one tile.
    h1 = jnp.dot(s_ref[...], w1s_ref[...], preferred_element_type=jnp.float32)
    h1 = h1 + jnp.dot(a_ref[...], w1a_ref[...],
                      preferred_element_type=jnp.float32)
    h1 = jnp.maximum(h1 + b1_ref[...], 0.0)                        # (TM, H1)

    # Layer 2: MXU matmul, lane-dense N = 384.
    h2 = jnp.dot(h1, w2_ref[...], preferred_element_type=jnp.float32)
    h2 = jnp.maximum(h2 + b2_ref[...], 0.0)                        # (TM, H2)

    # Layer 3 (N=1): VPU multiply + XLU cross-lane reduce instead of a
    # degenerate 1-column MXU matmul.
    q = jnp.sum(h2 * w3_ref[...], axis=-1, keepdims=True) + b3_ref[...]  # (TM,1)

    # Lane-dense store: broadcast the scalar column across 128 lanes
    # (unmasked vst); sliced back to (B, 1) outside the kernel.
    o_ref[...] = jnp.broadcast_to(q, o_ref.shape).astype(o_ref.dtype)


def critic_forward(state, action, kparams, *, tm=512):
    """state: (B, state_dim), action: (B, action_dim), kparams: packed params."""
    B, state_dim = state.shape
    action_dim = action.shape[1]

    TM = min(tm, _round_up(B, 8))          # f32 sublane multiple
    Bp = _round_up(B, TM)
    if Bp != B:                            # zero-pad batch to whole tiles
        state = jnp.pad(state, ((0, Bp - B), (0, 0)))
        action = jnp.pad(action, ((0, Bp - B), (0, 0)))

    w1s, w1a, b1 = kparams["w1_s"], kparams["w1_a"], kparams["b1"]
    w2, b2 = kparams["w2"], kparams["b2"]
    w3, b3 = kparams["w3"], kparams["b3"]

    # Weights/biases: same block every grid step -> stay VMEM-resident.
    resident = lambda shape: pl.BlockSpec(shape, lambda i: (0, 0))

    out = pl.pallas_call(
        _critic_kernel,
        out_shape=jax.ShapeDtypeStruct((Bp, OUT_PAD), jnp.float32),
        grid=(Bp // TM,),
        in_specs=[
            pl.BlockSpec((TM, state_dim), lambda i: (i, 0)),
            pl.BlockSpec((TM, action_dim), lambda i: (i, 0)),
            resident(w1s.shape), resident(w1a.shape), resident(b1.shape),
            resident(w2.shape), resident(b2.shape),
            resident(w3.shape), resident(b3.shape),
        ],
        out_specs=pl.BlockSpec((TM, OUT_PAD), lambda i: (i, 0)),
        compiler_params=pltpu.CompilerParams(
            dimension_semantics=("parallel",)),
    )(state, action, w1s, w1a, b1, w2, b2, w3, b3)

    # Slice the lane-dense slab back to the PyTorch (B, 1) output.
    return out[:B, :1]


def init_critic_params(key, state_dim, action_dim):
    """Unpadded params, PyTorch nn.Linear init U(-1/sqrt(fan_in), +1/sqrt(fan_in)).

    Weights stored as (in_features, out_features) == PyTorch weight.T.
    """
    dims = [(state_dim + action_dim, H1_RAW), (H1_RAW, H2_RAW), (H2_RAW, 1)]
    params = {}
    for i, (fan_in, fan_out) in enumerate(dims, start=1):
        key, kw, kb = jax.random.split(key, 3)
        bound = 1.0 / jnp.sqrt(jnp.float32(fan_in))
        params[f"w{i}"] = jax.random.uniform(
            kw, (fan_in, fan_out), jnp.float32, minval=-bound, maxval=bound)
        params[f"b{i}"] = jax.random.uniform(
            kb, (1, fan_out), jnp.float32, minval=-bound, maxval=bound)
    return params


def pack_critic_params(params, state_dim):
    """Split W1 by input (fused concat) and zero-pad hidden dims to 512 / 384."""
    w1, b1 = params["w1"], params["b1"]
    w2, b2 = params["w2"], params["b2"]
    w3, b3 = params["w3"], params["b3"]

    pad_h1 = H1 - H1_RAW
    pad_h2 = H2 - H2_RAW

    w1_s = jnp.pad(w1[:state_dim, :], ((0, 0), (0, pad_h1)))      # (S, 512)
    w1_a = jnp.pad(w1[state_dim:, :], ((0, 0), (0, pad_h1)))      # (A, 512)
    b1_p = jnp.pad(b1, ((0, 0), (0, pad_h1)))                     # (1, 512)
    w2_p = jnp.pad(w2, ((0, pad_h1), (0, pad_h2)))                # (512, 384)
    b2_p = jnp.pad(b2, ((0, 0), (0, pad_h2)))                     # (1, 384)
    w3_p = jnp.pad(w3.T, ((0, 0), (0, pad_h2)))                   # (1, 384)
    b3_p = b3                                                     # (1, 1)

    return {"w1_s": w1_s, "w1_a": w1_a, "b1": b1_p,
            "w2": w2_p, "b2": b2_p, "w3": w3_p, "b3": b3_p}


def critic_reference(state, action, params):
    """Pure-JAX reference on the UNPADDED params (validates padding path too)."""
    x = jnp.concatenate([state, action], axis=1)
    x = jnp.maximum(x @ params["w1"] + params["b1"], 0.0)
    x = jnp.maximum(x @ params["w2"] + params["b2"], 0.0)
    return x @ params["w3"] + params["b3"]


if __name__ == "__main__":
    B, state_dim, action_dim = 8, 16, 4

    key = jax.random.PRNGKey(0)
    key, ks, ka = jax.random.split(key, 3)
    state = jax.random.normal(ks, (B, state_dim), jnp.float32)
    action = jax.random.normal(ka, (B, action_dim), jnp.float32)

    params = init_critic_params(key, state_dim, action_dim)
    kparams = pack_critic_params(params, state_dim)

    out = critic_forward(state, action, kparams)
    out = jax.block_until_ready(out)

    ref = critic_reference(state, action, params)
    assert out.shape == (B, 1), out.shape
    assert jnp.allclose(out, ref, atol=1e-4, rtol=1e-4), (out, ref)

    print("KERNEL_OK")
</pallas_src>

<mosaic_0001>
module attributes {stable_mosaic.version = 11 : i64} {
  func.func @_critic_kernel(%arg0: i32, %arg1: memref<8x16xf32, #tpu.memory_space<vmem>>, %arg2: memref<8x4xf32, #tpu.memory_space<vmem>>, %arg3: memref<16x512xf32, #tpu.memory_space<vmem>>, %arg4: memref<4x512xf32, #tpu.memory_space<vmem>>, %arg5: memref<1x512xf32, #tpu.memory_space<vmem>>, %arg6: memref<512x384xf32, #tpu.memory_space<vmem>>, %arg7: memref<1x384xf32, #tpu.memory_space<vmem>>, %arg8: memref<1x384xf32, #tpu.memory_space<vmem>>, %arg9: memref<1x1xf32, #tpu.memory_space<vmem>>, %arg10: memref<8x128xf32, #tpu.memory_space<vmem>>) attributes {dimension_semantics = [#tpu.dimension_semantics<parallel>], iteration_bounds = array<i64: 1>, scalar_prefetch = 0 : i64, scratch_operands = 0 : i64, tpu.core_type = #tpu.core_type<tc>, window_params = [{transform_indices = @transform_0, window_bounds = array<i64: 8, 16>}, {transform_indices = @transform_1, window_bounds = array<i64: 8, 4>}, {pipeline_mode = #tpu.pipeline_mode<synchronous>, transform_indices = @transform_2, window_bounds = array<i64: 16, 512>}, {pipeline_mode = #tpu.pipeline_mode<synchronous>, transform_indices = @transform_3, window_bounds = array<i64: 4, 512>}, {pipeline_mode = #tpu.pipeline_mode<synchronous>, transform_indices = @transform_4, window_bounds = array<i64: 1, 512>}, {pipeline_mode = #tpu.pipeline_mode<synchronous>, transform_indices = @transform_5, window_bounds = array<i64: 512, 384>}, {pipeline_mode = #tpu.pipeline_mode<synchronous>, transform_indices = @transform_6, window_bounds = array<i64: 1, 384>}, {pipeline_mode = #tpu.pipeline_mode<synchronous>, transform_indices = @transform_7, window_bounds = array<i64: 1, 384>}, {pipeline_mode = #tpu.pipeline_mode<synchronous>, transform_indices = @transform_8, window_bounds = array<i64: 1, 1>}, {transform_indices = @transform_9, window_bounds = array<i64: 8, 128>}]} {
    %c0 = arith.constant 0 : index
    %c0_0 = arith.constant 0 : index
    %0 = vector.load %arg1[%c0, %c0_0] : memref<8x16xf32, #tpu.memory_space<vmem>>, vector<8x16xf32>
    %c0_1 = arith.constant 0 : index
    %c0_2 = arith.constant 0 : index
    %1 = vector.load %arg3[%c0_1, %c0_2] : memref<16x512xf32, #tpu.memory_space<vmem>>, vector<16x512xf32>
    %cst = arith.constant dense<0.000000e+00> : vector<8x512xf32>
    %2 = tpu.matmul %0, %1, %cst {dimension_numbers = #tpu.dot_dimension_numbers<[1], [0], [0], [1], [0, 0, 1, 1], [], []>} : vector<8x16xf32>, vector<16x512xf32>, vector<8x512xf32> -> vector<8x512xf32>
    %c0_3 = arith.constant 0 : index
    %c0_4 = arith.constant 0 : index
    %3 = vector.load %arg2[%c0_3, %c0_4] : memref<8x4xf32, #tpu.memory_space<vmem>>, vector<8x4xf32>
    %c0_5 = arith.constant 0 : index
    %c0_6 = arith.constant 0 : index
    %4 = vector.load %arg4[%c0_5, %c0_6] : memref<4x512xf32, #tpu.memory_space<vmem>>, vector<4x512xf32>
    %cst_7 = arith.constant dense<0.000000e+00> : vector<8x512xf32>
    %5 = tpu.matmul %3, %4, %cst_7 {dimension_numbers = #tpu.dot_dimension_numbers<[1], [0], [0], [1], [0, 0, 1, 1], [], []>} : vector<8x4xf32>, vector<4x512xf32>, vector<8x512xf32> -> vector<8x512xf32>
    %6 = arith.addf %2, %5 : vector<8x512xf32>
    %c0_8 = arith.constant 0 : index
    %c0_9 = arith.constant 0 : index
    %7 = vector.load %arg5[%c0_8, %c0_9] : memref<1x512xf32, #tpu.memory_space<vmem>>, vector<1x512xf32>
    %8 = vector.broadcast %7 : vector<1x512xf32> to vector<8x512xf32>
    %9 = arith.addf %6, %8 : vector<8x512xf32>
    %cst_10 = arith.constant 0.000000e+00 : f32
    %10 = vector.broadcast %cst_10 : f32 to vector<8x512xf32>
    %11 = arith.maximumf %9, %10 : vector<8x512xf32>
    %c0_11 = arith.constant 0 : index
    %c0_12 = arith.constant 0 : index
    %12 = vector.load %arg6[%c0_11, %c0_12] : memref<512x384xf32, #tpu.memory_space<vmem>>, vector<512x384xf32>
    %cst_13 = arith.constant dense<0.000000e+00> : vector<8x384xf32>
    %13 = tpu.matmul %11, %12, %cst_13 {dimension_numbers = #tpu.dot_dimension_numbers<[1], [0], [0], [1], [0, 0, 1, 1], [], []>} : vector<8x512xf32>, vector<512x384xf32>, vector<8x384xf32> -> vector<8x384xf32>
    %c0_14 = arith.constant 0 : index
    %c0_15 = arith.constant 0 : index
    %14 = vector.load %arg7[%c0_14, %c0_15] : memref<1x384xf32, #tpu.memory_space<vmem>>, vector<1x384xf32>
    %15 = vector.broadcast %14 : vector<1x384xf32> to vector<8x384xf32>
    %16 = arith.addf %13, %15 : vector<8x384xf32>
    %cst_16 = arith.constant 0.000000e+00 : f32
    %17 = vector.broadcast %cst_16 : f32 to vector<8x384xf32>
    %18 = arith.maximumf %16, %17 : vector<8x384xf32>
    %c0_17 = arith.constant 0 : index
    %c0_18 = arith.constant 0 : index
    %19 = vector.load %arg8[%c0_17, %c0_18] : memref<1x384xf32, #tpu.memory_space<vmem>>, vector<1x384xf32>
    %20 = vector.broadcast %19 : vector<1x384xf32> to vector<8x384xf32>
    %21 = arith.mulf %18, %20 : vector<8x384xf32>
    %cst_19 = arith.constant dense<0.000000e+00> : vector<8xf32>
    %22 = vector.multi_reduction <add>, %21, %cst_19 [1] : vector<8x384xf32> to vector<8xf32>
    %23 = vector.shape_cast %22 : vector<8xf32> to vector<8x1xf32>
    %c0_20 = arith.constant 0 : index
    %c0_21 = arith.constant 0 : index
    %24 = vector.load %arg9[%c0_20, %c0_21] : memref<1x1xf32, #tpu.memory_space<vmem>>, vector<1x1xf32>
    %25 = vector.broadcast %24 : vector<1x1xf32> to vector<8x1xf32>
    %26 = arith.addf %23, %25 : vector<8x1xf32>
    %27 = vector.shape_cast %26 : vector<8x1xf32> to vector<8x1xf32>
    %28 = vector.broadcast %27 : vector<8x1xf32> to vector<8x128xf32>
    %c0_22 = arith.constant 0 : index
    %c0_23 = arith.constant 0 : index
    %29 = vector.load %arg10[%c0_22, %c0_23] : memref<8x128xf32, #tpu.memory_space<vmem>>, vector<8x128xf32>
    tpu.vector_store %arg10[%c0_22, %c0_23], %28 {strides = array<i32>} : memref<8x128xf32, #tpu.memory_space<vmem>>, vector<8x128xf32>,
    return
  }
  func.func @transform_0(%arg0: i32) -> (i32, i32) {
    %c0_i32 = arith.constant 0 : i32
    %c0_i32_0 = arith.constant 0 : i32
    return %arg0, %c0_i32 : i32, i32
  }
  func.func @transform_1(%arg0: i32) -> (i32, i32) {
    %c0_i32 = arith.constant 0 : i32
    %c0_i32_0 = arith.constant 0 : i32
    return %arg0, %c0_i32 : i32, i32
  }
  func.func @transform_2(%arg0: i32) -> (i32, i32) {
    %c0_i32 = arith.constant 0 : i32
    %c0_i32_0 = arith.constant 0 : i32
    %c0_i32_1 = arith.constant 0 : i32
    return %c0_i32, %c0_i32_0 : i32, i32
  }
  func.func @transform_3(%arg0: i32) -> (i32, i32) {
    %c0_i32 = arith.constant 0 : i32
    %c0_i32_0 = arith.constant 0 : i32
    %c0_i32_1 = arith.constant 0 : i32
    return %c0_i32, %c0_i32_0 : i32, i32
  }
  func.func @transform_4(%arg0: i32) -> (i32, i32) {
    %c0_i32 = arith.constant 0 : i32
    %c0_i32_0 = arith.constant 0 : i32
    %c0_i32_1 = arith.constant 0 : i32
    return %c0_i32, %c0_i32_0 : i32, i32
  }
  func.func @transform_5(%arg0: i32) -> (i32, i32) {
    %c0_i32 = arith.constant 0 : i32
    %c0_i32_0 = arith.constant 0 : i32
    %c0_i32_1 = arith.constant 0 : i32
    return %c0_i32, %c0_i32_0 : i32, i32
  }
  func.func @transform_6(%arg0: i32) -> (i32, i32) {
    %c0_i32 = arith.constant 0 : i32
    %c0_i32_0 = arith.constant 0 : i32
    %c0_i32_1 = arith.constant 0 : i32
    return %c0_i32, %c0_i32_0 : i32, i32
  }
  func.func @transform_7(%arg0: i32) -> (i32, i32) {
    %c0_i32 = arith.constant 0 : i32
    %c0_i32_0 = arith.constant 0 : i32
    %c0_i32_1 = arith.constant 0 : i32
    return %c0_i32, %c0_i32_0 : i32, i32
  }
  func.func @transform_8(%arg0: i32) -> (i32, i32) {
    %c0_i32 = arith.constant 0 : i32
    %c0_i32_0 = arith.constant 0 : i32
    %c0_i32_1 = arith.constant 0 : i32
    return %c0_i32, %c0_i32_0 : i32, i32
  }
  func.func @transform_9(%arg0: i32) -> (i32, i32) {
    %c0_i32 = arith.constant 0 : i32
    %c0_i32_0 = arith.constant 0 : i32
    return %arg0, %c0_i32 : i32, i32
  }
}

</mosaic_0001>

<bundles_post_ra>
// kernel: tpu_custom_call.1
= control target key start
LH: loop header
LB: loop body
LE: loop exit
PB: predicated region body
PF: predicated region fallthrough
CT: control target
= control target key end

     0   :  { %s1493_s0 = inlined_call_operand.vmem [shape: f32[8,16], index: 0, kind: input, shape index: {}]   ;;  %s1494_s1 = inlined_call_operand.vmem [shape: f32[8,4], index: 1, kind: input, shape index: {}]   ;;  %s1495_s2 = inlined_call_operand.hbm [shape: f32[16,512], index: 2, kind: input, shape index: {}]   ;;  %s1496_s3 = inlined_call_operand.vmem [shape: f32[4,512], index: 3, kind: input, shape index: {}]   ;;  %s1497_s4 = inlined_call_operand.vmem [shape: f32[1,512], index: 4, kind: input, shape index: {}]   ;;  %s1498_s5 = inlined_call_operand.hbm [shape: f32[512,384], index: 5, kind: input, shape index: {}]   ;;  %s1499_s6 = inlined_call_operand.vmem [shape: f32[1,384], index: 6, kind: input, shape index: {}]   ;;  %s1500_s7 = inlined_call_operand.vmem [shape: f32[1,384], index: 7, kind: input, shape index: {}]   ;;  %s1501_s8 = inlined_call_operand.<no memory space> [shape: f32[1,1], index: 8, kind: input, shape index: {}]   ;;  %s1502_s9 = inlined_call_operand.hbm [shape: f32[8,128], index: 9, kind: output, shape index: {}]  }
   0x1   :  { %v14_v0 = vstv %s1501_s8 }
   0x2   :  { %15 = vst [vmem:[#allocation2] sm:$0x1] %v14_v0 }
   0x3   :  { %16 = vsyncpa [#allocation4], 0 }
   0x4   :  { %17 = vsyncpa [#allocation7], 0 }
   0x5   :  { %18 = vsyncpa [#allocation5], 0  ;;  %s1329_s11 = smov [#allocation3]   ;;  %s1257_s15 = scalar_lea.hbm %s1495_s2, 1024 }
   0x6   :  { %s28_s12 = sshll.u32 %s1329_s11, 4  ;;  %p1258_p0 = scmp.ne.s32.totalorder %s1495_s2, %s1257_s15  ;;  %s29_s12 = int_to_ptr.vmem [resolvable:$true] %s28_s12 }
   0x7   :  { %p1261_p1 = scmp.lt.u32.totalorder %s1257_s15, %s1495_s2 }
   0x9   :  { %p1263_p2 = pnand %p1261_p1, %p1258_p0 }
   0xb   :  { %1266 = shalt.err (!%p1263_p2)
}
   0xc   :  { %s1267_s8 = scalar_lea.vmem %s29_s12, 1024  ;;  %p1272_p4 = scmp.lt.s32.totalorder %s29_s12, %s29_s12 }
   0xd   :  { %p1268_p3 = scmp.ne.s32.totalorder %s29_s12, %s1267_s8  ;;  %p1273_p5 = scmp.lt.s32.totalorder %s1267_s8, %s1267_s8 }
   0xf   :  { %p1274_p6 = por %p1273_p5, %p1272_p4 }
  0x11   :  { %p1275_p7 = pnand %p1274_p6, %p1268_p3 }
  0x13   :  { %1278 = shalt.err (!%p1275_p7)
}
  0x14   :  { %s1330_s20 = smov 512   ;;  %s1331_s21 = smov 32  }
  0x15   :  { %34 = dma.hbm_to_vmem [thread:$0]  %s1495_s2, 1024, %s29_s12, [#allocation4], %s1330_s20, %s1330_s20, %s1331_s21  }
  0x16   :  { %s1332_s24 = smov [#allocation6]   ;;  %s1279_s28 = scalar_lea.hbm %s1498_s5, 24576 }
  0x17   :  { %s44_s25 = sshll.u32 %s1332_s24, 4  ;;  %p1280_p8 = scmp.ne.s32.totalorder %s1498_s5, %s1279_s28  ;;  %s45_s25 = int_to_ptr.vmem [resolvable:$true] %s44_s25 }
  0x18   :  { %p1283_p9 = scmp.lt.u32.totalorder %s1279_s28, %s1498_s5 }
  0x1a   :  { %p1285_p10 = pnand %p1283_p9, %p1280_p8 }
  0x1c   :  { %1288 = shalt.err (!%p1285_p10)
}
  0x1d   :  { %s1289_s13 = scalar_lea.vmem %s45_s25, 24576  ;;  %p1294_p12 = scmp.lt.s32.totalorder %s45_s25, %s45_s25 }
  0x1e   :  { %p1290_p11 = scmp.ne.s32.totalorder %s45_s25, %s1289_s13  ;;  %p1295_p13 = scmp.lt.s32.totalorder %s1289_s13, %s1289_s13 }
  0x20   :  { %p1296_p0 = por %p1295_p13, %p1294_p12 }
  0x22   :  { %p1297_p1 = pnand %p1296_p0, %p1290_p11 }
  0x24   :  { %1300 = shalt.err (!%p1297_p1)
}
  0x25   :  { %s1333_s2 = smov 384   ;;  %s1334_s12 = smov 24  }
  0x26   :  { %50 = dma.hbm_to_vmem [thread:$0]  %s1498_s5, 24576, %s45_s25, [#allocation7], %s1333_s2, %s1333_s2, %s1334_s12  }
  0x27   :  { %1323 = dma.done.wait [#allocation4], 1024  }
  0x28   :  { %1324 = vsyncadd [#allocation4], 4294966272 }
  0x29   :  { %1325 = dma.done.wait [#allocation7], 24576  }
  0x2a   :  { %1326 = vsyncadd [#allocation7], 4294942720  ;;  %v1335_v1 = vmov 0.0   ;;  %v73_v2 = vld [vmem:[%s1496_s3] sm:$0xff]  ;;  %vm83_vm0 = vcmask 1043456   ;;  %v74_v3 = vld [vmem:[%s1496_s3 + $0x8] sm:$0xff] }
  0x2b   :  { %156 = vmatprep.mubr.f32.mxu1 %v1335_v1  ;;  %v77_v4 = vcombine.high %v73_v2, %v73_v2  ;;  %v78_v5 = vcombine.high %v74_v3, %v74_v3  ;;  %v65_v6 = vld [vmem:[#allocation3 + $0x8] sm:$0xff]  ;;  %v72_v8 = vld [vmem:[%s1494_s1] sm:$0xff]  ;;  %vm79_vm1 = vcmask 31744   ;;  %v420_v20 = vld [vmem:[#allocation6 + $0x50] sm:$0xff]  ;;  %vm234_vm2 = vcmask 130048  }
  0x2c   :  { %v69_v7 = vld [vmem:[#allocation3 + $0x28] sm:$0xff]  ;;  %v64_v9 = vld [vmem:[#allocation3] sm:$0xff]  ;;  %v67_v12 = vld [vmem:[#allocation3 + $0x18] sm:$0xff] }
  0x2d   :  { %958 = vmatprep.subr.msk.mxu1 %vm83_vm0, %v77_v4  ;;  %v1037_v10 = vpack.c.bf16 %v69_v7, %v65_v6  ;;  %v68_v11 = vld [vmem:[#allocation3 + $0x20] sm:$0xff]  ;;  %v71_v13 = vld [vmem:[#allocation3 + $0x38] sm:$0xff]  ;;  %v411_v14 = vld [vmem:[#allocation6 + $0x8] sm:$0xff] }
  0x2e   :  { %959 = vmatpush1.msk.msra.mxu1 %vm83_vm0, %v73_v2  ;;  %v414_v15 = vld [vmem:[#allocation6 + $0x20] sm:$0xff]  ;;  %v413_v18 = vld [vmem:[#allocation6 + $0x18] sm:$0xff]  ;;  %v1039_v21 = vpack.c.bf16 %v68_v11, %v64_v9  ;;  %v416_v24 = vld [vmem:[#allocation6 + $0x30] sm:$0xff]  ;;  %v1041_v27 = vpack.c.bf16 %v71_v13, %v67_v12 }
  0x2f   :  { %v410_v16 = vld [vmem:[#allocation6] sm:$0xff]  ;;  %960 = vmatmul.mubr.msk.f32.vlgmr.msra.gmra.mrb[0].mxu1 %vm79_vm1, %v72_v8  ;;  %961 = vmatprep.subr.msk.mxu1 %vm83_vm0, %v78_v5  ;;  %v1045_v17 = vpack.c.bf16 %v414_v15, %v411_v14  ;;  %v417_v19 = vld [vmem:[#allocation6 + $0x38] sm:$0xff]  ;;  %v419_v25 = vld [vmem:[#allocation6 + $0x48] sm:$0xff] }
  0x30   :  { %962 = vmatpush1.msk.msra.mxu1 %vm83_vm0, %v74_v3  ;;  %227 = vmatprep.mubr.f32.mxu1 %v1335_v1  ;;  %v1047_v22 = vpack.c.bf16 %v413_v18, %v410_v16  ;;  %v1049_v23 = vpack.c.bf16 %v420_v20, %v417_v19  ;;  %v423_v26 = vld [vmem:[#allocation6 + $0x68] sm:$0xff]  ;;  %v66_v28 = vld [vmem:[#allocation3 + $0x10] sm:$0xff]  ;;  %v426_v30 = vld [vmem:[#allocation6 + $0x80] sm:$0xff]  ;;  %v1051_v31 = vpack.c.bf16 %v419_v25, %v416_v24 }
  0x31   :  { %1038 = vmatprep.subr.bf16.mxu1 %v1037_v10  ;;  %v70_v29 = vld [vmem:[#allocation3 + $0x30] sm:$0xff]  ;;  %1046 = vmatprep.subr.bf16.mxu0 %v1045_v17  ;;  %v1053_v32 = vpack.c.bf16 %v426_v30, %v423_v26  ;;  %v422_v33 = vld [vmem:[#allocation6 + $0x60] sm:$0xff]  ;;  %v425_v34 = vld [vmem:[#allocation6 + $0x78] sm:$0xff] }
  0x32   :  { %1048 = vmatpush1.bf16.msra.mxu0 %v1047_v22  ;;  %v63_v35 = vld [vmem:[%s1493_s0] sm:$0xff]  ;;  %v1043_v36 = vpack.c.bf16 %v70_v29, %v66_v28  ;;  %v432_v38 = vld [vmem:[#allocation6 + $0xb0] sm:$0xff]  ;;  %v1055_v39 = vpack.c.bf16 %v425_v34, %v422_v33  ;;  %v431_v42 = vld [vmem:[#allocation6 + $0xa8] sm:$0xff] }
  0x33   :  { %963 = vmatmul.mubr.msk.f32.vlgmr.msra.gmra.mrb[2].mxu1 %vm79_vm1, %v72_v8  ;;  %1050 = vmatprep.subr.bf16.mxu0 %v1049_v23  ;;  %v429_v37 = vld [vmem:[#allocation6 + $0x98] sm:$0xff]  ;;  %v428_v41 = vld [vmem:[#allocation6 + $0x90] sm:$0xff]  ;;  %v435_v43 = vld [vmem:[#allocation6 + $0xc8] sm:$0xff] }
  0x34   :  { %1040 = vmatpush1.bf16.msra.mxu1 %v1039_v21  ;;  %302 = vmatprep.mubr.f32.mxu1 %v1335_v1  ;;  %v1057_v40 = vpack.c.bf16 %v432_v38, %v429_v37  ;;  %v438_v44 = vld [vmem:[#allocation6 + $0xe0] sm:$0xff]  ;;  %v460_v45 = vld [vmem:[#allocation6 + $0x190] sm:$0xff]  ;;  %v463_v46 = vld [vmem:[#allocation6 + $0x1a8] sm:$0xff]  ;;  %v1059_v47 = vpack.c.bf16 %v431_v42, %v428_v41 }
  0x35   :  { %1042 = vmatprep.subr.bf16.mxu1 %v1041_v27  ;;  %v434_v48 = vld [vmem:[#allocation6 + $0xc0] sm:$0xff]  ;;  %v1173_v49 = vpack.c.bf16 %v463_v46, %v460_v45  ;;  %v412_v50 = vld [vmem:[#allocation6 + $0x10] sm:$0xff]  ;;  %v1061_v51 = vpack.c.bf16 %v438_v44, %v435_v43  ;;  %v437_v52 = vld [vmem:[#allocation6 + $0xd8] sm:$0xff] }
  0x36   :  { %1052 = vmatpush1.bf16.msra.mxu0 %v1051_v31  ;;  %v441_v53 = vld [vmem:[#allocation6 + $0xf8] sm:$0xff]  ;;  %v415_v54 = vld [vmem:[#allocation6 + $0x28] sm:$0xff]  ;;  %v444_v55 = vld [vmem:[#allocation6 + $0x110] sm:$0xff]  ;;  %v1063_v62 = vpack.c.bf16 %v437_v52, %v434_v48 }
  0x37   :  { %964 = vmatmul.mubr.msk.f32.vlgmr.msra.gmra.mrb[0].mxu1 %vm234_vm2, %v63_v35  ;;  %1054 = vmatprep.subr.bf16.mxu0 %v1053_v32  ;;  %v1175_v56 = vpack.c.bf16 %v415_v54, %v412_v50  ;;  %v466_v57 = vld [vmem:[#allocation6 + $0x1c0] sm:$0xff]  ;;  %v469_v58 = vld [vmem:[#allocation6 + $0x1d8] sm:$0xff]  ;;  %v440_v63 = vld [vmem:[#allocation6 + $0xf0] sm:$0xff]  ;;  %v1065_v2 = vpack.c.bf16 %v444_v55, %v441_v53 }
  0x38   :  { %1044 = vmatpush1.bf16.msra.mxu1 %v1043_v36  ;;  %373 = vmatprep.mubr.f32.mxu1 %v1335_v1  ;;  %v1177_v59 = vpack.c.bf16 %v469_v58, %v466_v57  ;;  %v418_v60 = vld [vmem:[#allocation6 + $0x40] sm:$0xff]  ;;  %v421_v61 = vld [vmem:[#allocation6 + $0x58] sm:$0xff]  ;;  %v472_v1 = vld [vmem:[#allocation6 + $0x1f0] sm:$0xff] }
  0x39   :  { %1174 = vmatprep.subr.bf16.mxu1 %v1173_v49  ;;  %v1179_v0 = vpack.c.bf16 %v421_v61, %v418_v60  ;;  %v443_v3 = vld [vmem:[#allocation6 + $0x108] sm:$0xff]  ;;  %v450_v6 = vld [vmem:[#allocation6 + $0x140] sm:$0xff]  ;;  %v424_v8 = vld [vmem:[#allocation6 + $0x70] sm:$0xff] }
  0x3a   :  { %1056 = vmatpush1.bf16.msra.mxu0 %v1055_v39  ;;  %v447_v4 = vld [vmem:[#allocation6 + $0x128] sm:$0xff]  ;;  %v478_v10 = vld [vmem:[#allocation6 + $0x220] sm:$0xff]  ;;  %v481_v11 = vld [vmem:[#allocation6 + $0x238] sm:$0xff]  ;;  %v1067_v12 = vpack.c.bf16 %v443_v3, %v440_v63 }
  0x3b   :  { %965 = vmatmul.mubr.msk.f32.vlgmr.msra.gmra.mrb[2].mxu1 %vm234_vm2, %v63_v35  ;;  %1058 = vmatprep.subr.bf16.mxu0 %v1057_v40  ;;  %v475_v5 = vld [vmem:[#allocation6 + $0x208] sm:$0xff]  ;;  %v446_v13 = vld [vmem:[#allocation6 + $0x120] sm:$0xff]  ;;  %v449_v14 = vld [vmem:[#allocation6 + $0x138] sm:$0xff]  ;;  %v1069_v16 = vpack.c.bf16 %v450_v6, %v447_v4  ;;  %v1185_v18 = vpack.c.bf16 %v481_v11, %v478_v10 }
  0x3c   :  { %1176 = vmatpush3.bf16.msra.mxu1 %v1175_v56  ;;  %v1181_v7 = vpack.c.bf16 %v475_v5, %v472_v1  ;;  %v427_v9 = vld [vmem:[#allocation6 + $0x88] sm:$0xff]  ;;  %v453_v17 = vld [vmem:[#allocation6 + $0x158] sm:$0xff]  ;;  %v430_v19 = vld [vmem:[#allocation6 + $0xa0] sm:$0xff]  ;;  %v1071_v24 = vpack.c.bf16 %v449_v14, %v446_v13 }
  0x3d   :  { %1178 = vmatprep.subr.bf16.mxu1 %v1177_v59  ;;  %v1183_v15 = vpack.c.bf16 %v427_v9, %v424_v8  ;;  %v433_v20 = vld [vmem:[#allocation6 + $0xb8] sm:$0xff]  ;;  %v456_v21 = vld [vmem:[#allocation6 + $0x170] sm:$0xff]  ;;  %v487_v23 = vld [vmem:[#allocation6 + $0x268] sm:$0xff] }
  0x3e   :  { %1060 = vmatpush1.bf16.msra.mxu0 %v1059_v47  ;;  %v484_v22 = vld [vmem:[#allocation6 + $0x250] sm:$0xff]  ;;  %v455_v26 = vld [vmem:[#allocation6 + $0x168] sm:$0xff]  ;;  %v1187_v27 = vpack.c.bf16 %v433_v20, %v430_v19  ;;  %v1073_v28 = vpack.c.bf16 %v456_v21, %v453_v17  ;;  %v462_v33 = vld [vmem:[#allocation6 + $0x1a0] sm:$0xff] }
  0x3f   :  { %1062 = vmatprep.subr.bf16.mxu0 %v1061_v51  ;;  %v452_v25 = vld [vmem:[#allocation6 + $0x150] sm:$0xff]  ;;  %v459_v29 = vld [vmem:[#allocation6 + $0x188] sm:$0xff]  ;;  %v1189_v30 = vpack.c.bf16 %v487_v23, %v484_v22  ;;  %v490_v34 = vld [vmem:[#allocation6 + $0x280] sm:$0xff] }
  0x40   :  { %1180 = vmatpush3.bf16.msra.mxu1 %v1179_v0  ;;  %v436_v31 = vld [vmem:[#allocation6 + $0xd0] sm:$0xff]  ;;  %v439_v32 = vld [vmem:[#allocation6 + $0xe8] sm:$0xff]  ;;  %v493_v35 = vld [vmem:[#allocation6 + $0x298] sm:$0xff]  ;;  %v1075_v36 = vpack.c.bf16 %v455_v26, %v452_v25  ;;  %v1077_v40 = vpack.c.bf16 %v462_v33, %v459_v29 }
  0x41   :  { %1182 = vmatprep.subr.bf16.mxu1 %v1181_v7  ;;  %v458_v37 = vld [vmem:[#allocation6 + $0x180] sm:$0xff]  ;;  %v461_v38 = vld [vmem:[#allocation6 + $0x198] sm:$0xff]  ;;  %v1191_v39 = vpack.c.bf16 %v439_v32, %v436_v31  ;;  %v1193_v42 = vpack.c.bf16 %v493_v35, %v490_v34  ;;  %v468_v45 = vld [vmem:[#allocation6 + $0x1d0] sm:$0xff] }
  0x42   :  { %1064 = vmatpush1.bf16.msra.mxu0 %v1063_v62  ;;  %v465_v41 = vld [vmem:[#allocation6 + $0x1b8] sm:$0xff]  ;;  %v442_v43 = vld [vmem:[#allocation6 + $0x100] sm:$0xff]  ;;  %v496_v46 = vld [vmem:[#allocation6 + $0x2b0] sm:$0xff]  ;;  %v1079_v48 = vpack.c.bf16 %v461_v38, %v458_v37 }
  0x43   :  { %1066 = vmatprep.subr.bf16.mxu0 %v1065_v2  ;;  %v445_v44 = vld [vmem:[#allocation6 + $0x118] sm:$0xff]  ;;  %v499_v47 = vld [vmem:[#allocation6 + $0x2c8] sm:$0xff]  ;;  %v464_v49 = vld [vmem:[#allocation6 + $0x1b0] sm:$0xff]  ;;  %v1081_v51 = vpack.c.bf16 %v468_v45, %v465_v41 }
  0x44   :  { %1184 = vmatpush3.bf16.msra.mxu1 %v1183_v15  ;;  %v1195_v50 = vpack.c.bf16 %v445_v44, %v442_v43  ;;  %v467_v52 = vld [vmem:[#allocation6 + $0x1c8] sm:$0xff]  ;;  %v1197_v53 = vpack.c.bf16 %v499_v47, %v496_v46  ;;  %v448_v54 = vld [vmem:[#allocation6 + $0x130] sm:$0xff]  ;;  %v474_v57 = vld [vmem:[#allocation6 + $0x200] sm:$0xff] }
  0x45   :  { %1186 = vmatprep.subr.bf16.mxu1 %v1185_v18  ;;  %v451_v55 = vld [vmem:[#allocation6 + $0x148] sm:$0xff]  ;;  %v1083_v58 = vpack.c.bf16 %v467_v52, %v464_v49  ;;  %v470_v61 = vld [vmem:[#allocation6 + $0x1e0] sm:$0xff]  ;;  %v473_v62 = vld [vmem:[#allocation6 + $0x1f8] sm:$0xff] }
  0x46   :  { %1068 = vmatpush1.bf16.msra.mxu0 %v1067_v12  ;;  %v471_v56 = vld [vmem:[#allocation6 + $0x1e8] sm:$0xff]  ;;  %v1199_v59 = vpack.c.bf16 %v451_v55, %v448_v54  ;;  %v477_v63 = vld [vmem:[#allocation6 + $0x218] sm:$0xff]  ;;  %v480_v0 = vld [vmem:[#allocation6 + $0x230] sm:$0xff]  ;;  %v1087_v1 = vpack.c.bf16 %v473_v62, %v470_v61 }
  0x47   :  { %1070 = vmatprep.subr.bf16.mxu0 %v1069_v16  ;;  %v1085_v60 = vpack.c.bf16 %v474_v57, %v471_v56  ;;  %v1089_v2 = vpack.c.bf16 %v480_v0, %v477_v63  ;;  %v476_v3 = vld [vmem:[#allocation6 + $0x210] sm:$0xff]  ;;  %v479_v4 = vld [vmem:[#allocation6 + $0x228] sm:$0xff]  ;;  %v486_v6 = vld [vmem:[#allocation6 + $0x260] sm:$0xff] }
  0x48   :  { %1188 = vmatpush3.bf16.msra.mxu1 %v1187_v27  ;;  %v483_v5 = vld [vmem:[#allocation6 + $0x248] sm:$0xff]  ;;  %v1091_v7 = vpack.c.bf16 %v479_v4, %v476_v3  ;;  %v482_v9 = vld [vmem:[#allocation6 + $0x240] sm:$0xff]  ;;  %v485_v10 = vld [vmem:[#allocation6 + $0x258] sm:$0xff] }
  0x49   :  { %1190 = vmatprep.subr.bf16.mxu1 %v1189_v30  ;;  %v1093_v8 = vpack.c.bf16 %v486_v6, %v483_v5  ;;  %v489_v11 = vld [vmem:[#allocation6 + $0x278] sm:$0xff]  ;;  %v492_v12 = vld [vmem:[#allocation6 + $0x290] sm:$0xff]  ;;  %v1095_v13 = vpack.c.bf16 %v485_v10, %v482_v9  ;;  %v491_v16 = vld [vmem:[#allocation6 + $0x288] sm:$0xff] }
  0x4a   :  { %1072 = vmatpush1.bf16.msra.mxu0 %v1071_v24  ;;  %v1097_v14 = vpack.c.bf16 %v492_v12, %v489_v11  ;;  %v488_v15 = vld [vmem:[#allocation6 + $0x270] sm:$0xff]  ;;  %v495_v17 = vld [vmem:[#allocation6 + $0x2a8] sm:$0xff]  ;;  %v498_v18 = vld [vmem:[#allocation6 + $0x2c0] sm:$0xff] }
  0x4b   :  { %1074 = vmatprep.subr.bf16.mxu0 %v1073_v28  ;;  %v1099_v19 = vpack.c.bf16 %v491_v16, %v488_v15  ;;  %v1101_v20 = vpack.c.bf16 %v498_v18, %v495_v17  ;;  %v494_v21 = vld [vmem:[#allocation6 + $0x2a0] sm:$0xff]  ;;  %v497_v22 = vld [vmem:[#allocation6 + $0x2b8] sm:$0xff]  ;;  %v504_v25 = vld [vmem:[#allocation6 + $0x2f0] sm:$0xff] }
  0x4c   :  { %1192 = vmatpush3.bf16.msra.mxu1 %v1191_v39  ;;  %v1103_v23 = vpack.c.bf16 %v497_v22, %v494_v21  ;;  %v501_v24 = vld [vmem:[#allocation6 + $0x2d8] sm:$0xff]  ;;  %v502_v26 = vld [vmem:[#allocation6 + $0x2e0] sm:$0xff]  ;;  %v500_v29 = vld [vmem:[#allocation6 + $0x2d0] sm:$0xff] }
  0x4d   :  { %1194 = vmatprep.subr.bf16.mxu1 %v1193_v42  ;;  %v1105_v27 = vpack.c.bf16 %v504_v25, %v501_v24  ;;  %v505_v28 = vld [vmem:[#allocation6 + $0x2f8] sm:$0xff]  ;;  %v503_v30 = vld [vmem:[#allocation6 + $0x2e8] sm:$0xff]  ;;  %v454_v33 = vld [vmem:[#allocation6 + $0x160] sm:$0xff]  ;;  %v382_v42 = vlaneseq }
  0x4e   :  { %1076 = vmatpush1.bf16.msra.mxu0 %v1075_v36  ;;  %v1201_v31 = vpack.c.bf16 %v505_v28, %v502_v26  ;;  %v1107_v32 = vpack.c.bf16 %v503_v30, %v500_v29  ;;  %v457_v34 = vld [vmem:[#allocation6 + $0x178] sm:$0xff]  ;;  %v507_v36 = vld [vmem:[#allocation6 + $0x308] sm:$0xff]  ;;  %v510_v37 = vld [vmem:[#allocation6 + $0x320] sm:$0xff] }
  0x4f   :  { %1078 = vmatprep.subr.bf16.mxu0 %v1077_v40  ;;  %v1203_v35 = vpack.c.bf16 %v457_v34, %v454_v33  ;;  %v556_v38 = vld [vmem:[#allocation6 + $0x490] sm:$0xff]  ;;  %v1109_v39 = vpack.c.bf16 %v510_v37, %v507_v36  ;;  %v559_v40 = vld [vmem:[#allocation6 + $0x4a8] sm:$0xff]  ;;  %v1439_v43 = vshrl.u32 %v382_v42, 7  ;;  %v1447_v45 = vld [vmem:[%s1497_s4] sm:$0xf] }
  0x50   :  { %1196 = vmatpush3.bf16.msra.mxu1 %v1195_v50  ;;  %v1205_v41 = vpack.c.bf16 %v559_v40, %v556_v38  ;;  %v509_v52 = vld [vmem:[#allocation6 + $0x318] sm:$0xff]  ;;  %v508_v55 = vld [vmem:[#allocation6 + $0x310] sm:$0xff]  ;;  %v511_v56 = vld [vmem:[#allocation6 + $0x328] sm:$0xff] }
  0x51   :  { %1198 = vmatprep.subr.bf16.mxu1 %v1197_v53  ;;  %v1442_v44 = vsub.s32 0, %v1439_v43  ;;  %v1450_v46 = vsub.s32 1, %v1439_v43  ;;  %v396_v49 = vsub.s32 3, %v1439_v43  ;;  %v513_v57 = vld [vmem:[#allocation6 + $0x338] sm:$0xff]  ;;  %v562_v61 = vld [vmem:[#allocation6 + $0x4c0] sm:$0xff]  ;;  %v512_v3 = vld [vmem:[#allocation6 + $0x330] sm:$0xff] }
  0x52   :  { %1080 = vmatpush1.bf16.msra.mxu0 %v1079_v48  ;;  %v565_v62 = vld [vmem:[#allocation6 + $0x4d8] sm:$0xff]  ;;  %v515_v4 = vld [vmem:[#allocation6 + $0x348] sm:$0xff]  ;;  %v514_v9 = vld [vmem:[#allocation6 + $0x340] sm:$0xff] }
  0x53   :  { %1082 = vmatprep.subr.bf16.mxu0 %v1081_v51  ;;  %v385_v47 = vrot.slane %v1447_v45, %v1442_v44  ;;  %v389_v48 = vrot.slane %v1447_v45, %v1450_v46  ;;  %v506_v51 = vld [vmem:[#allocation6 + $0x300] sm:$0xff]  ;;  %v517_v10 = vld [vmem:[#allocation6 + $0x358] sm:$0xff]  ;;  %v519_v11 = vld [vmem:[#allocation6 + $0x368] sm:$0xff]  ;;  %v1115_v17 = vpack.c.bf16 %v515_v4, %v512_v3 }
  0x54   :  { %1200 = vmatpush3.bf16.msra.mxu1 %v1199_v59  ;;  %v397_v59 = vrot.slane %v1447_v45, %v396_v49  ;;  %v571_v15 = vld [vmem:[#allocation6 + $0x508] sm:$0xff]  ;;  %v1211_v18 = vpack.c.bf16 %v517_v10, %v514_v9  ;;  %v525_v25 = vld [vmem:[#allocation6 + $0x398] sm:$0xff]  ;;  %v528_v26 = vld [vmem:[#allocation6 + $0x3b0] sm:$0xff]  ;;  %v1461_v10 = vsub.s32 2, %v1439_v43 }
  0x55   :  { %1202 = vmatprep.subr.bf16.mxu1 %v1201_v31  ;;  %v523_v24 = vld [vmem:[#allocation6 + $0x388] sm:$0xff]  ;;  %v577_v28 = vld [vmem:[#allocation6 + $0x538] sm:$0xff]  ;;  %v524_v31 = vld [vmem:[#allocation6 + $0x390] sm:$0xff]  ;;  %v1121_v33 = vpack.c.bf16 %v528_v26, %v525_v25 }
  0x56   :  { %1084 = vmatpush1.bf16.msra.mxu0 %v1083_v58  ;;  %v529_v36 = vld [vmem:[#allocation6 + $0x3b8] sm:$0xff]  ;;  %v531_v37 = vld [vmem:[#allocation6 + $0x3c8] sm:$0xff]  ;;  %v534_v38 = vld [vmem:[#allocation6 + $0x3e0] sm:$0xff] }
  0x57   :  { %1086 = vmatprep.subr.bf16.mxu0 %v1085_v60  ;;  %v516_v60 = vld [vmem:[#allocation6 + $0x350] sm:$0xff]  ;;  %v583_v40 = vld [vmem:[#allocation6 + $0x568] sm:$0xff]  ;;  %v1125_v49 = vpack.c.bf16 %v534_v38, %v531_v37  ;;  %v546_v3 = vld [vmem:[#allocation6 + $0x440] sm:$0xff] }
  0x58   :  { %1204 = vmatpush3.bf16.msra.mxu1 %v1203_v35  ;;  %v526_v35 = vld [vmem:[#allocation6 + $0x3a0] sm:$0xff]  ;;  %v592_v4 = vld [vmem:[#allocation6 + $0x5b0] sm:$0xff]  ;;  %v545_v9 = vld [vmem:[#allocation6 + $0x438] sm:$0xff] }
  0x59   :  { %1206 = vmatprep.subr.bf16.mxu1 %v1205_v41  ;;  %v1219_v42 = vpack.c.bf16 %v529_v36, %v526_v35  ;;  %v550_v25 = vld [vmem:[#allocation6 + $0x460] sm:$0xff]  ;;  %v553_v26 = vld [vmem:[#allocation6 + $0x478] sm:$0xff]  ;;  %v564_v35 = vld [vmem:[#allocation6 + $0x4d0] sm:$0xff] }
  0x5a   :  { %1088 = vmatpush1.bf16.msra.mxu0 %v1087_v1  ;;  %v1111_v1 = vpack.c.bf16 %v509_v52, %v506_v51  ;;  %v532_v51 = vld [vmem:[#allocation6 + $0x3d0] sm:$0xff]  ;;  %v535_v52 = vld [vmem:[#allocation6 + $0x3e8] sm:$0xff] }
  0x5b   :  { %1090 = vmatprep.subr.bf16.mxu0 %v1089_v2  ;;  %v1207_v2 = vpack.c.bf16 %v511_v56, %v508_v55  ;;  %v586_v55 = vld [vmem:[#allocation6 + $0x580] sm:$0xff]  ;;  %v589_v56 = vld [vmem:[#allocation6 + $0x598] sm:$0xff] }
  0x5e   :  { %1092 = vmatpush1.bf16.msra.mxu0 %v1091_v7  ;;  %v1113_v7 = vpack.c.bf16 %v516_v60, %v513_v57  ;;  %v539_v60 = vld [vmem:[#allocation6 + $0x408] sm:$0xff] }
  0x5f   :  { %1094 = vmatprep.subr.bf16.mxu0 %v1093_v8  ;;  %v1209_v8 = vpack.c.bf16 %v565_v62, %v562_v61  ;;  %v1225_v62 = vpack.c.bf16 %v589_v56, %v586_v55  ;;  %v575_v55 = vld [vmem:[#allocation6 + $0x528] sm:$0xff] }
  0x60   :  { %v579_v56 = vld [vmem:[#allocation6 + $0x548] sm:$0xff] }
  0x62   :  { %1096 = vmatpush1.bf16.msra.mxu0 %v1095_v13  ;;  %v522_v13 = vld [vmem:[#allocation6 + $0x380] sm:$0xff] }
  0x63   :  { %1098 = vmatprep.subr.bf16.mxu0 %v1097_v14  ;;  %v568_v14 = vld [vmem:[#allocation6 + $0x4f0] sm:$0xff]  ;;  %v1117_v21 = vpack.c.bf16 %v522_v13, %v519_v11 }
  0x64   :  { %v1213_v22 = vpack.c.bf16 %v571_v15, %v568_v14  ;;  %v544_v13 = vld [vmem:[#allocation6 + $0x430] sm:$0xff]  ;;  %v547_v14 = vld [vmem:[#allocation6 + $0x448] sm:$0xff]  ;;  %v549_v15 = vld [vmem:[#allocation6 + $0x458] sm:$0xff] }
  0x66   :  { %1100 = vmatpush1.bf16.msra.mxu0 %v1099_v19  ;;  %v518_v19 = vld [vmem:[#allocation6 + $0x360] sm:$0xff] }
  0x67   :  { %1102 = vmatprep.subr.bf16.mxu0 %v1101_v20  ;;  %v521_v20 = vld [vmem:[#allocation6 + $0x378] sm:$0xff] }
  0x68   :  { %v1119_v29 = vpack.c.bf16 %v521_v20, %v518_v19  ;;  %v1231_v20 = vpack.c.bf16 %v547_v14, %v544_v13  ;;  %v600_v13 = vld [vmem:[#allocation6 + $0x5f0] sm:$0xff] }
  0x6a   :  { %1104 = vmatpush1.bf16.msra.mxu0 %v1103_v23  ;;  %v520_v23 = vld [vmem:[#allocation6 + $0x370] sm:$0xff] }
  0x6b   :  { %1106 = vmatprep.subr.bf16.mxu0 %v1105_v27  ;;  %v574_v27 = vld [vmem:[#allocation6 + $0x520] sm:$0xff]  ;;  %v1215_v30 = vpack.c.bf16 %v523_v24, %v520_v23  ;;  %v551_v24 = vld [vmem:[#allocation6 + $0x468] sm:$0xff] }
  0x6c   :  { %v1217_v34 = vpack.c.bf16 %v577_v28, %v574_v27  ;;  %v555_v27 = vld [vmem:[#allocation6 + $0x488] sm:$0xff]  ;;  %v558_v28 = vld [vmem:[#allocation6 + $0x4a0] sm:$0xff] }
  0x6e   :  { %1108 = vmatpush1.bf16.msra.mxu0 %v1107_v32  ;;  %v527_v32 = vld [vmem:[#allocation6 + $0x3a8] sm:$0xff] }
  0x6f   :  { %1110 = vmatprep.subr.bf16.mxu0 %v1109_v39  ;;  %v580_v39 = vld [vmem:[#allocation6 + $0x550] sm:$0xff]  ;;  %v1123_v41 = vpack.c.bf16 %v527_v32, %v524_v31  ;;  %v1141_v32 = vpack.c.bf16 %v558_v28, %v555_v27 }
 0x10a   :  { %v304_v50 = vpop.f32.mrb[0].mxu1 }
 0x10b   :  { %v402_v53 = vadd.f32 %v385_v47, %v304_v50  ;;  %v306_v54 = vpop.f32.mrb[1].mxu1  ;;  %v530_v47 = vld [vmem:[#allocation6 + $0x3c0] sm:$0xff]  ;;  %v1221_v50 = vpack.c.bf16 %v583_v40, %v580_v39  ;;  %v560_v39 = vld [vmem:[#allocation6 + $0x4b0] sm:$0xff]  ;;  %v563_v40 = vld [vmem:[#allocation6 + $0x4c8] sm:$0xff] }
 0x10c   :  { %v403_v58 = vadd.f32 %v389_v48, %v306_v54  ;;  %v533_v48 = vld [vmem:[#allocation6 + $0x3d8] sm:$0xff]  ;;  %v540_v54 = vld [vmem:[#allocation6 + $0x410] sm:$0xff] }
 0x10d   :  { %v406_v5 = vmax.f32 %v402_v53, 0.0  ;;  %v537_v53 = vld [vmem:[#allocation6 + $0x3f8] sm:$0xff]  ;;  %v1127_v57 = vpack.c.bf16 %v533_v48, %v530_v47  ;;  %v566_v48 = vld [vmem:[#allocation6 + $0x4e0] sm:$0xff] }
 0x10e   :  { %v407_v63 = vmax.f32 %v403_v58, 0.0  ;;  %v1458_v0 = vpop.f32.mrb[2].mxu1  ;;  %v1223_v58 = vpack.c.bf16 %v535_v52, %v532_v51  ;;  %v1129_v61 = vpack.c.bf16 %v540_v54, %v537_v53  ;;  %v576_v51 = vld [vmem:[#allocation6 + $0x530] sm:$0xff] }
 0x10f   :  { %v377_v6 = vpop.f32.mrb[3].mxu1  ;;  %v572_v54 = vld [vmem:[#allocation6 + $0x510] sm:$0xff] }
 0x110   :  { %v405_v12 = vadd.f32 %v397_v59, %v377_v6  ;;  %683 = vmatprep.mubr.f32.mxu0 %v407_v63  ;;  %825 = vmatprep.mubr.f32.mxu1 %v407_v63  ;;  %v536_v59 = vld [vmem:[#allocation6 + $0x3f0] sm:$0xff]  ;;  %v538_v63 = vld [vmem:[#allocation6 + $0x400] sm:$0xff] }
 0x111   :  { %684 = vmatmul.mubr.f32.vlgmr.msra.gmra.mrb[0].mxu0 %v406_v5  ;;  %826 = vmatmul.mubr.f32.vlgmr.msra.gmra.mrb[4].mxu1 %v406_v5  ;;  %v595_v5 = vld [vmem:[#allocation6 + $0x5c8] sm:$0xff]  ;;  %v1131_v6 = vpack.c.bf16 %v539_v60, %v536_v59  ;;  %v578_v60 = vld [vmem:[#allocation6 + $0x540] sm:$0xff] }
 0x112   :  { %v409_v16 = vmax.f32 %v405_v12, 0.0  ;;  %1112 = vmatpush1.bf16.msra.mxu0 %v1111_v1  ;;  %1208 = vmatpush3.bf16.msra.mxu1 %v1207_v2  ;;  %v541_v1 = vld [vmem:[#allocation6 + $0x418] sm:$0xff]  ;;  %v543_v2 = vld [vmem:[#allocation6 + $0x428] sm:$0xff]  ;;  %v1229_v12 = vpack.c.bf16 %v595_v5, %v592_v4 }
 0x113   :  { %1114 = vmatprep.subr.bf16.mxu0 %v1113_v7  ;;  %1210 = vmatprep.subr.bf16.mxu1 %v1209_v8  ;;  %v1227_v7 = vpack.c.bf16 %v541_v1, %v538_v63  ;;  %v542_v8 = vld [vmem:[#allocation6 + $0x420] sm:$0xff]  ;;  %v1133_v11 = vpack.c.bf16 %v546_v3, %v543_v2  ;;  %v588_v63 = vld [vmem:[#allocation6 + $0x590] sm:$0xff]  ;;  %v587_v4 = vld [vmem:[#allocation6 + $0x588] sm:$0xff] }
 0x114   :  { %754 = vmatprep.mubr.f32.mxu0 %v409_v16  ;;  %895 = vmatprep.mubr.f32.mxu1 %v409_v16  ;;  %v552_v16 = vld [vmem:[#allocation6 + $0x470] sm:$0xff]  ;;  %v1135_v19 = vpack.c.bf16 %v545_v9, %v542_v8  ;;  %v591_v5 = vld [vmem:[#allocation6 + $0x5a8] sm:$0xff]  ;;  %v590_v9 = vld [vmem:[#allocation6 + $0x5a0] sm:$0xff] }
 0x115   :  { %v1137_v43 = vpack.c.bf16 %v552_v16, %v549_v15  ;;  %v584_v3 = vld [vmem:[#allocation6 + $0x570] sm:$0xff] }
 0x116   :  { %1116 = vmatpush1.bf16.msra.mxu0 %v1115_v17  ;;  %1212 = vmatpush3.bf16.msra.mxu1 %v1211_v18  ;;  %v598_v17 = vld [vmem:[#allocation6 + $0x5e0] sm:$0xff]  ;;  %v601_v18 = vld [vmem:[#allocation6 + $0x5f8] sm:$0xff]  ;;  %v596_v16 = vld [vmem:[#allocation6 + $0x5d0] sm:$0xff] }
 0x117   :  { %1118 = vmatprep.subr.bf16.mxu0 %v1117_v21  ;;  %1214 = vmatprep.subr.bf16.mxu1 %v1213_v22  ;;  %v548_v21 = vld [vmem:[#allocation6 + $0x450] sm:$0xff]  ;;  %v393_v22 = vrot.slane %v1447_v45, %v1461_v10  ;;  %v1233_v23 = vpack.c.bf16 %v601_v18, %v598_v17  ;;  %v554_v45 = vld [vmem:[#allocation6 + $0x480] sm:$0xff]  ;;  %v599_v17 = vld [vmem:[#allocation6 + $0x5e8] sm:$0xff] }
 0x118   :  { %v1171_v18 = vpack.c.bf16 %v599_v17, %v596_v16 }
 0x119   :  { %v1466_v31 = vadd.f32 %v393_v22, %v1458_v0  ;;  %v1147_v0 = vpack.c.bf16 %v563_v40, %v560_v39  ;;  %v602_v22 = vld [vmem:[%s1499_s6] sm:$0x7]  ;;  %s1337_s6 = smov [#allocation8]  }
 0x11a   :  { %1120 = vmatpush1.bf16.msra.mxu0 %v1119_v29  ;;  %1216 = vmatpush3.bf16.msra.mxu1 %v1215_v30  ;;  %v1139_v29 = vpack.c.bf16 %v551_v24, %v548_v21  ;;  %v1235_v30 = vpack.c.bf16 %v553_v26, %v550_v25  ;;  %v607_v28 = vrot.slane %v602_v22, %v1442_v44 }
 0x11b   :  { %1122 = vmatprep.subr.bf16.mxu0 %v1121_v33  ;;  %1218 = vmatprep.subr.bf16.mxu1 %v1217_v34  ;;  %v557_v33 = vld [vmem:[#allocation6 + $0x498] sm:$0xff]  ;;  %v408_v37 = vmax.f32 %v1466_v31, 0.0 }
 0x11c   :  { %v561_v34 = vld [vmem:[#allocation6 + $0x4b8] sm:$0xff]  ;;  %v1143_v36 = vpack.c.bf16 %v557_v33, %v554_v45 }
 0x11d   :  { %v1145_v38 = vpack.c.bf16 %v564_v35, %v561_v34  ;;  %v904_v31 = vld [vmem:[%s1500_s7] sm:$0x7]  ;;  %s948_s7 = sshll.u32 %s1337_s6, 4  ;;  %s949_s7 = int_to_ptr.vmem [resolvable:$true] %s948_s7 }
 0x11e   :  { %1124 = vmatpush1.bf16.msra.mxu0 %v1123_v41  ;;  %1220 = vmatpush3.bf16.msra.mxu1 %v1219_v42  ;;  %v567_v41 = vld [vmem:[#allocation6 + $0x4e8] sm:$0xff]  ;;  %v570_v42 = vld [vmem:[#allocation6 + $0x500] sm:$0xff]  ;;  %v909_v45 = vrot.slane %v904_v31, %v1442_v44  ;;  %v913_v35 = vrot.slane %v904_v31, %v1450_v46  ;;  %v917_v39 = vrot.slane %v904_v31, %v1461_v10  ;;  %s1301_s24 = scalar_lea.vmem %s949_s7, 128  ;;  %p1306_p3 = scmp.lt.s32.totalorder %s949_s7, %s949_s7 }
 0x11f   :  { %1126 = vmatprep.subr.bf16.mxu0 %v1125_v49  ;;  %1222 = vmatprep.subr.bf16.mxu1 %v1221_v50  ;;  %v1149_v47 = vpack.c.bf16 %v570_v42, %v567_v41  ;;  %v569_v49 = vld [vmem:[#allocation6 + $0x4f8] sm:$0xff]  ;;  %p1302_p2 = scmp.ne.s32.totalorder %s949_s7, %s1301_s24  ;;  %p1307_p4 = scmp.lt.s32.totalorder %s1301_s24, %s1301_s24 }
 0x120   :  { %v573_v50 = vld [vmem:[#allocation6 + $0x518] sm:$0xff]  ;;  %v1151_v52 = vpack.c.bf16 %v569_v49, %v566_v48  ;;  %v1336_v48 = vmov 0  }
 0x121   :  { %v1153_v53 = vpack.c.bf16 %v576_v51, %v573_v50  ;;  %1254 = vset.pattern.permute.xlu0 %v1336_v48  ;;  %v966_v49 = vld [vmem:[#allocation2] ss:$0 sm:$0xff]  ;;  %p1308_p5 = por %p1307_p4, %p1306_p3 }
 0x122   :  { %1128 = vmatpush1.bf16.msra.mxu0 %v1127_v57  ;;  %1224 = vmatpush3.bf16.msra.mxu1 %v1223_v58  ;;  %v582_v57 = vld [vmem:[#allocation6 + $0x560] sm:$0xff]  ;;  %v1155_v58 = vpack.c.bf16 %v575_v55, %v572_v54 }
 0x123   :  { %1130 = vmatprep.subr.bf16.mxu0 %v1129_v61  ;;  %1226 = vmatprep.subr.bf16.mxu1 %v1225_v62  ;;  %v1157_v59 = vpack.c.bf16 %v582_v57, %v579_v56  ;;  %v581_v61 = vld [vmem:[#allocation6 + $0x558] sm:$0xff]  ;;  %p1309_p6 = pnand %p1308_p5, %p1302_p2 }
 0x124   :  { %v585_v62 = vld [vmem:[#allocation6 + $0x578] sm:$0xff]  ;;  %v1159_v1 = vpack.c.bf16 %v581_v61, %v578_v60 }
 0x125   :  { %v1161_v2 = vpack.c.bf16 %v588_v63, %v585_v62 }
 0x126   :  { %1132 = vmatpush1.bf16.msra.mxu0 %v1131_v6  ;;  %1228 = vmatpush3.bf16.msra.mxu1 %v1227_v7  ;;  %v594_v6 = vld [vmem:[#allocation6 + $0x5c0] sm:$0xff]  ;;  %v1163_v7 = vpack.c.bf16 %v587_v4, %v584_v3 }
 0x127   :  { %1134 = vmatprep.subr.bf16.mxu0 %v1133_v11  ;;  %1230 = vmatprep.subr.bf16.mxu1 %v1229_v12  ;;  %v1165_v8 = vpack.c.bf16 %v594_v6, %v591_v5  ;;  %v593_v11 = vld [vmem:[#allocation6 + $0x5b8] sm:$0xff] }
 0x128   :  { %v597_v12 = vld [vmem:[#allocation6 + $0x5d8] sm:$0xff]  ;;  %v1167_v14 = vpack.c.bf16 %v593_v11, %v590_v9 }
 0x129   :  { %v1169_v15 = vpack.c.bf16 %v600_v13, %v597_v12 }
 0x12a   :  { %1136 = vmatpush1.bf16.msra.mxu0 %v1135_v19  ;;  %1232 = vmatpush3.bf16.msra.mxu1 %v1231_v20 }
 0x12b   :  { %1138 = vmatprep.subr.bf16.mxu0 %v1137_v43  ;;  %1234 = vmatprep.subr.bf16.mxu1 %v1233_v23  ;;  %v615_v43 = vrot.slane %v602_v22, %v1461_v10 }
 0x12e   :  { %1140 = vmatpush1.bf16.msra.mxu0 %v1139_v29  ;;  %1236 = vmatpush3.bf16.msra.mxu1 %v1235_v30  ;;  %v611_v29 = vrot.slane %v602_v22, %v1450_v46 }
 0x12f   :  { %1142 = vmatprep.subr.bf16.mxu0 %v1141_v32 }
 0x131   :  { %896 = vmatmul.mubr.f32.vlgmr.msra.gmra.mrb[6].mxu1 %v408_v37 }
 0x132   :  { %1144 = vmatpush1.bf16.msra.mxu0 %v1143_v36 }
 0x133   :  { %1146 = vmatprep.subr.bf16.mxu0 %v1145_v38 }
 0x136   :  { %1148 = vmatpush1.bf16.msra.mxu0 %v1147_v0 }
 0x137   :  { %1150 = vmatprep.subr.bf16.mxu0 %v1149_v47 }
 0x13a   :  { %1152 = vmatpush1.bf16.msra.mxu0 %v1151_v52 }
 0x13b   :  { %1154 = vmatprep.subr.bf16.mxu0 %v1153_v53 }
 0x13e   :  { %1156 = vmatpush1.bf16.msra.mxu0 %v1155_v58 }
 0x13f   :  { %1158 = vmatprep.subr.bf16.mxu0 %v1157_v59 }
 0x142   :  { %1160 = vmatpush1.bf16.msra.mxu0 %v1159_v1 }
 0x143   :  { %1162 = vmatprep.subr.bf16.mxu0 %v1161_v2 }
 0x146   :  { %1164 = vmatpush1.bf16.msra.mxu0 %v1163_v7 }
 0x147   :  { %1166 = vmatprep.subr.bf16.mxu0 %v1165_v8 }
 0x14a   :  { %1168 = vmatpush1.bf16.msra.mxu0 %v1167_v14 }
 0x14b   :  { %1170 = vmatprep.subr.bf16.mxu0 %v1169_v15 }
 0x14e   :  { %1172 = vmatpush1.bf16.msra.mxu0 %v1171_v18 }
 0x151   :  { %755 = vmatmul.mubr.f32.vlgmr.msra.gmra.mrb[0].mxu0 %v408_v37 }
 0x1e4   :  { %v999_v19 = vpop.f32.mrb[4].mxu1 }
 0x1e5   :  { %v1000_v20 = vpop.f32.mrb[5].mxu1 }
 0x1e6   :  { %v1001_v21 = vadd.f32 %v1000_v20, %v999_v19 }
 0x1e8   :  { %v828_v25 = vadd.f32 %v1001_v21, %v615_v43 }
 0x204   :  { %v1034_v23 = vpop.f32.mrb[6].mxu1 }
 0x205   :  { %v1035_v24 = vpop.f32.mrb[7].mxu1 }
 0x206   :  { %v1036_v26 = vadd.f32 %v1035_v24, %v1034_v23 }
 0x208   :  { %v898_v27 = vadd.f32 %v1036_v26, %v828_v25 }
 0x20a   :  { %v903_v37 = vmax.f32 %v898_v27, 0.0 }
 0x20c   :  { %v923_v42 = vmul.f32 %v917_v39, %v903_v37 }
 0x224   :  { %v756_v30 = vpop.f32.mrb[0].mxu0 }
 0x225   :  { %v1237_v32 = vadd.f32 %v756_v30, %v607_v28  ;;  %v758_v33 = vpop.f32.mrb[1].mxu0 }
 0x226   :  { %v1238_v34 = vadd.f32 %v758_v33, %v611_v29 }
 0x227   :  { %v901_v36 = vmax.f32 %v1237_v32, 0.0 }
 0x228   :  { %v902_v38 = vmax.f32 %v1238_v34, 0.0 }
 0x229   :  { %v921_v40 = vmul.f32 %v909_v45, %v901_v36 }
 0x22a   :  { %v922_v41 = vmul.f32 %v913_v35, %v902_v38 }
 0x22c   :  { %v924_v0 = vadd.f32 %v922_v41, %v921_v40 }
 0x22e   :  { %v925_v47 = vadd.f32 %v924_v0, %v923_v42 }
 0x230   :  { %926 = vadd.xlane.f32.xlu0 %v925_v47 }
 0x2bd   :  { %v927_v50 = vpop.xlane.xlu0 %926 }
 0x2be   :  { %v935_v44 = vadd.f32 %v966_v49, %v927_v50 }
 0x2c0   :  { %938 = vperm.xlu0 %1254, %v935_v44  }
 0x33f   :  { %v939_v46 = vpop.permute.xlu0 %938 }
 0x340   :  { %941 = vst [vmem:[#allocation8] sm:$0xff] %v939_v46 }
 0x341   :  { %1312 = shalt.err (!%p1309_p6)
}
 0x342   :  { %s1313_s27 = scalar_lea.hbm %s1502_s9, 128 }
 0x343   :  { %p1314_p7 = scmp.ne.s32.totalorder %s1502_s9, %s1313_s27  ;;  %p1317_p8 = scmp.lt.u32.totalorder %s1313_s27, %s1502_s9 }
 0x345   :  { %p1319_p9 = pnand %p1317_p8, %p1314_p7 }
 0x347   :  { %1322 = shalt.err (!%p1319_p9)
}
 0x348   :  { %951 = dma.vmem_to_hbm [thread:$0]  %s949_s7, 128, %s1502_s9, [#allocation5]  }
 0x349   :  { %1327 = dma.done.wait [#allocation5], 128  }
 0x34a   :  { %1328 = vsyncadd [#allocation5], 4294967168 }
 0x34b   :  { %955 = vsyncpa [#allocation4], 1 }
 0x34c   :  { %956 = vsyncpa [#allocation7], 1 }
 0x34d   :  { %957 = vsyncpa [#allocation5], 1 }

</bundles_post_ra>
